<compile_context>
chip_gen: v7x
topology: tpu7x:2x2x1
jax: 0.10.0
libtpu: 0.0.40
codegen_flags: <defaults>
</compile_context>

<pallas_src>
import functools

import jax
import jax.numpy as jnp
from jax.experimental import pallas as pl
from jax.experimental.pallas import tpu as pltpu


_DEF_BLOCK_BUDGET = 4 * 1024 * 1024   # bytes of one x block per grid step
_VMEM_LIMIT = 32 * 1024 * 1024        # safe scoped VMEM on v5e/v6e/v7x
# Effective VMEM per step ~= 4 * block (double-buffered in + out) + temps,
# which stays well under _VMEM_LIMIT with the 4 MiB block budget.


# ---------------------------------------------------------------------------
# Shared MLP + sigmoid on a stacked (avg; max) pooled matrix.
#   pooled: (2*TB, C)  ->  gate: (TB, C)
# MLP(avg) + MLP(max) == rowwise-affine MLP on the stack, then sum the halves.
# ---------------------------------------------------------------------------
def _mlp_gate(pooled, w1, b1, w2, b2, tb):
    h = jnp.dot(pooled, w1, preferred_element_type=jnp.float32)
    h = jnp.maximum(h + b1, 0.0)                                   # (2*TB, Cr)
    att = jnp.dot(h, w2, preferred_element_type=jnp.float32) + b2  # (2*TB, C)
    return jax.nn.sigmoid(att[:tb] + att[tb:])                     # (TB, C)


# ---------------------------------------------------------------------------
# Fused path: pooling + MLP + sigmoid + rescale in one kernel, grid=(B//TB,).
# x block (TB, C, HW) stays resident in VMEM; x is read from HBM once.
# ---------------------------------------------------------------------------
def _fused_kernel(x_ref, w1_ref, b1_ref, w2_ref, b2_ref, y_ref, scale_ref,
                  *, inv_hw):
    x = x_ref[...].astype(jnp.float32)                    # (TB, C, HW)
    tb = x.shape[0]
    avg_pool = jnp.sum(x, axis=2) * inv_hw                # (TB, C)
    max_pool = jnp.max(x, axis=2)                         # (TB, C)
    pooled = jnp.concatenate([avg_pool, max_pool], axis=0)  # (2*TB, C)
    gate = _mlp_gate(pooled, w1_ref[...], b1_ref[...],
                     w2_ref[...], b2_ref[...], tb)        # (TB, C)
    y_ref[...] = (x * gate[:, :, None]).astype(y_ref.dtype)
    scale_ref[...] = gate[:, :, None].astype(scale_ref.dtype)


# ---------------------------------------------------------------------------
# Fallback pass 1: avg/max pooling over HW tiles + fused MLP -> compact gate.
#   grid = (B, n_tiles); batch "parallel", HW "arbitrary" (reduction).
# ---------------------------------------------------------------------------
def _pool_mlp_kernel(x_ref, w1_ref, b1_ref, w2_ref, b2_ref, scale_ref,
                     sum_acc, max_acc, *, inv_hw, hw_true, tile_hw, masked):
    t = pl.program_id(1)

    @pl.when(t == 0)
    def _init():
        sum_acc[...] = jnp.zeros_like(sum_acc)
        max_acc[...] = jnp.full_like(max_acc, -jnp.inf)

    x = x_ref[...].astype(jnp.float32)                    # (1, C, TILE_HW)
    if masked:
        lane = jax.lax.broadcasted_iota(jnp.int32, x.shape, 2)
        valid = (t * tile_hw + lane) < hw_true
        x_sum = jnp.where(valid, x, 0.0)
        x_max = jnp.where(valid, x, -jnp.inf)
    else:
        x_sum = x
        x_max = x
    sum_acc[...] += jnp.sum(x_sum, axis=2)
    max_acc[...] = jnp.maximum(max_acc[...], jnp.max(x_max, axis=2))

    @pl.when(t == pl.num_programs(1) - 1)
    def _finalize():
        avg_pool = sum_acc[...] * inv_hw                  # (1, C)
        max_pool = max_acc[...]                           # (1, C)
        pooled = jnp.concatenate([avg_pool, max_pool], axis=0)   # (2, C)
        gate = _mlp_gate(pooled, w1_ref[...], b1_ref[...],
                         w2_ref[...], b2_ref[...], tb=1)  # (1, C)
        scale_ref[...] = gate[:, :, None].astype(scale_ref.dtype)


# ---------------------------------------------------------------------------
# Fallback pass 2: lane-dense elementwise rescale  y = x * scale.
# ---------------------------------------------------------------------------
def _rescale_kernel(x_ref, scale_ref, y_ref):
    y_ref[...] = (x_ref[...] * scale_ref[...].astype(x_ref.dtype)).astype(
        y_ref.dtype)


# ---------------------------------------------------------------------------
# Tile pickers.
# ---------------------------------------------------------------------------
def _pick_tile_b(b, slab_bytes, budget_bytes):
    """Largest batch tile that fits the block budget while (when B>=2) keeping
    at least two parallel grid steps so both v7x TensorCores get work."""
    best = 1
    for tb in range(1, b + 1):
        if b % tb:
            continue
        if tb * slab_bytes > budget_bytes:
            continue
        if b >= 2 and b // tb < 2:
            continue
        best = tb
    return best


def _pick_tile_hw(hw, c, budget_bytes, itemsize):
    """Returns (tile_hw, hw_padded, needs_mask) for the two-pass fallback."""
    bytes_per_lane = c * itemsize
    max_lanes = max(128, (budget_bytes // max(bytes_per_lane, 1)) // 128 * 128)
    # Prefer the largest lane-dense (multiple-of-128) divisor of HW in budget.
    t = min(max_lanes, (hw // 128) * 128)
    while t >= 128:
        if hw % t == 0:
            return t, hw, False
        t -= 128
    # No lane-dense divisor: pad HW to a multiple of a budget-sized tile and
    # mask the padded lanes inside the pooling kernel.
    tile = min(max_lanes, ((hw + 127) // 128) * 128)
    hw_pad = ((hw + tile - 1) // tile) * tile
    return tile, hw_pad, True


# ---------------------------------------------------------------------------
# Wrapper.
# ---------------------------------------------------------------------------
def channel_gate(x, w1, b1, w2, b2, *, block_budget_bytes=_DEF_BLOCK_BUDGET):
    """x: (B, C, H, W). Returns (x * scale, compact gate of shape (B, C, 1, 1)).

    The compact gate is returned instead of a materialized broadcast of scale
    to x's shape (a full-size HBM write); broadcast lazily at the call site if
    the expanded tensor is truly required.
    """
    B, C, H, W = x.shape
    HW = H * W
    Cr = w1.shape[1]
    itemsize = jnp.dtype(x.dtype).itemsize

    x_flat = x.reshape(B, C, HW)
    b1_2d = b1.reshape(1, Cr)
    b2_2d = b2.reshape(1, C)

    slab_bytes = C * HW * itemsize

    if slab_bytes <= block_budget_bytes:
        # ---- fused single-pass path: x read once, y + compact gate written ----
        tb = _pick_tile_b(B, slab_bytes, block_budget_bytes)
        y_flat, scale = pl.pallas_call(
            functools.partial(_fused_kernel, inv_hw=1.0 / float(HW)),
            out_shape=(jax.ShapeDtypeStruct((B, C, HW), x.dtype),
                       jax.ShapeDtypeStruct((B, C, 1), jnp.float32)),
            grid=(B // tb,),
            in_specs=[
                pl.BlockSpec((tb, C, HW), lambda b: (b, 0, 0)),
                pl.BlockSpec((C, Cr), lambda b: (0, 0)),
                pl.BlockSpec((1, Cr), lambda b: (0, 0)),
                pl.BlockSpec((Cr, C), lambda b: (0, 0)),
                pl.BlockSpec((1, C), lambda b: (0, 0)),
            ],
            out_specs=(pl.BlockSpec((tb, C, HW), lambda b: (b, 0, 0)),
                       pl.BlockSpec((tb, C, 1), lambda b: (b, 0, 0))),
            compiler_params=pltpu.CompilerParams(
                dimension_semantics=("parallel",),
                vmem_limit_bytes=_VMEM_LIMIT),
        )(x_flat, w1, b1_2d, w2, b2_2d)
    else:
        # ---- two-pass fallback for oversized C*HW slabs ----
        tile_hw, hw_pad, masked = _pick_tile_hw(HW, C, block_budget_bytes,
                                                itemsize)
        n_tiles = hw_pad // tile_hw
        x_work = x_flat
        if hw_pad != HW:
            x_work = jnp.pad(x_flat, ((0, 0), (0, 0), (0, hw_pad - HW)))

        scale = pl.pallas_call(
            functools.partial(_pool_mlp_kernel, inv_hw=1.0 / float(HW),
                              hw_true=HW, tile_hw=tile_hw, masked=masked),
            out_shape=jax.ShapeDtypeStruct((B, C, 1), jnp.float32),
            grid=(B, n_tiles),
            in_specs=[
                pl.BlockSpec((1, C, tile_hw), lambda b, t: (b, 0, t)),
                pl.BlockSpec((C, Cr), lambda b, t: (0, 0)),
                pl.BlockSpec((1, Cr), lambda b, t: (0, 0)),
                pl.BlockSpec((Cr, C), lambda b, t: (0, 0)),
                pl.BlockSpec((1, C), lambda b, t: (0, 0)),
            ],
            out_specs=pl.BlockSpec((1, C, 1), lambda b, t: (b, 0, 0)),
            scratch_shapes=[
                pltpu.VMEM((1, C), jnp.float32),   # running sum
                pltpu.VMEM((1, C), jnp.float32),   # running max
            ],
            compiler_params=pltpu.CompilerParams(
                dimension_semantics=("parallel", "arbitrary"),
                vmem_limit_bytes=_VMEM_LIMIT),
        )(x_work, w1, b1_2d, w2, b2_2d)

        y_pad = pl.pallas_call(
            _rescale_kernel,
            out_shape=jax.ShapeDtypeStruct((B, C, hw_pad), x.dtype),
            grid=(B, n_tiles),
            in_specs=[
                pl.BlockSpec((1, C, tile_hw), lambda b, t: (b, 0, t)),
                pl.BlockSpec((1, C, 1), lambda b, t: (b, 0, 0)),
            ],
            out_specs=pl.BlockSpec((1, C, tile_hw), lambda b, t: (b, 0, t)),
            compiler_params=pltpu.CompilerParams(
                dimension_semantics=("parallel", "parallel"),
                vmem_limit_bytes=_VMEM_LIMIT),
        )(x_work, scale)
        y_flat = y_pad[:, :, :HW] if hw_pad != HW else y_pad

    y = y_flat.reshape(B, C, H, W)
    scale_compact = scale.reshape(B, C, 1, 1)
    return y, scale_compact


def reference(x, w1, b1, w2, b2):
    """Pure-JAX reference matching the PyTorch forward (pool_types=['avg','max'])."""
    B, C, H, W = x.shape
    xf = x.reshape(B, C, -1)
    avg_pool = jnp.mean(xf, axis=2)
    max_pool = jnp.max(xf, axis=2)

    def mlp(p):
        return jnp.maximum(p @ w1 + b1, 0.0) @ w2 + b2

    att = mlp(avg_pool) + mlp(max_pool)
    scale = jax.nn.sigmoid(att)[:, :, None, None]
    scale = jnp.broadcast_to(scale, x.shape)
    return x * scale, scale


def _check(x, w1, b1, w2, b2, **kw):
    y, gate = channel_gate(x, w1, b1, w2, b2, **kw)
    jax.block_until_ready((y, gate))
    y_ref, scale_ref = reference(x, w1, b1, w2, b2)
    assert jnp.allclose(y, y_ref, atol=1e-5, rtol=1e-5)
    assert jnp.allclose(jnp.broadcast_to(gate, x.shape), scale_ref,
                        atol=1e-5, rtol=1e-5)


if __name__ == "__main__":
    # Shapes consistent with ChannelGate(gate_channels=32, reduction_ratio=16).
    B, C, H, W = 2, 32, 16, 16
    reduction_ratio = 16
    Cr = C // reduction_ratio  # = 2

    key = jax.random.PRNGKey(0)
    kx, k1, k2, k3, k4, kx2 = jax.random.split(key, 6)

    x = jax.random.normal(kx, (B, C, H, W), dtype=jnp.float32)
    # Deterministic synthetic parameters (Linear(C, Cr) and Linear(Cr, C)).
    w1 = jax.random.normal(k1, (C, Cr), dtype=jnp.float32) * (1.0 / jnp.sqrt(C))
    b1 = jax.random.normal(k2, (Cr,), dtype=jnp.float32) * 0.1
    w2 = jax.random.normal(k3, (Cr, C), dtype=jnp.float32) * (1.0 / jnp.sqrt(Cr))
    b2 = jax.random.normal(k4, (C,), dtype=jnp.float32) * 0.1

    # TODO(synk): 'lp' and 'lse' pool branches of the original module (unused
    # by the default pool_types=['avg','max']) are not implemented.

    # 1) default fused single-pass path
    _check(x, w1, b1, w2, b2)

    # 2) two-pass fallback (forced by a tiny block budget), lane-dense tiles
    _check(x, w1, b1, w2, b2, block_budget_bytes=8 * 1024)

    # 3) two-pass fallback with a non-multiple-of-128 HW (masked padded lanes)
    x_odd = jax.random.normal(kx2, (B, C, 7, 7), dtype=jnp.float32)
    _check(x_odd, w1, b1, w2, b2, block_budget_bytes=4 * 1024)

    print("KERNEL_OK")
</pallas_src>

<mosaic_0001>
module attributes {stable_mosaic.version = 11 : i64} {
  func.func @_fused_kernel(%arg0: i32, %arg1: memref<1x32x256xf32, #tpu.memory_space<vmem>>, %arg2: memref<32x2xf32, #tpu.memory_space<vmem>>, %arg3: memref<1x2xf32, #tpu.memory_space<vmem>>, %arg4: memref<2x32xf32, #tpu.memory_space<vmem>>, %arg5: memref<1x32xf32, #tpu.memory_space<vmem>>, %arg6: memref<1x32x256xf32, #tpu.memory_space<vmem>>, %arg7: memref<1x32x1xf32, #tpu.memory_space<vmem>>) attributes {dimension_semantics = [#tpu.dimension_semantics<parallel>], iteration_bounds = array<i64: 2>, scalar_prefetch = 0 : i64, scratch_operands = 0 : i64, tpu.core_type = #tpu.core_type<tc>, window_params = [{transform_indices = @transform_0, window_bounds = array<i64: 1, 32, 256>}, {pipeline_mode = #tpu.pipeline_mode<synchronous>, transform_indices = @transform_1, window_bounds = array<i64: 32, 2>}, {pipeline_mode = #tpu.pipeline_mode<synchronous>, transform_indices = @transform_2, window_bounds = array<i64: 1, 2>}, {pipeline_mode = #tpu.pipeline_mode<synchronous>, transform_indices = @transform_3, window_bounds = array<i64: 2, 32>}, {pipeline_mode = #tpu.pipeline_mode<synchronous>, transform_indices = @transform_4, window_bounds = array<i64: 1, 32>}, {transform_indices = @transform_5, window_bounds = array<i64: 1, 32, 256>}, {transform_indices = @transform_6, window_bounds = array<i64: 1, 32, 1>}]} {
    %c0 = arith.constant 0 : index
    %c0_0 = arith.constant 0 : index
    %c0_1 = arith.constant 0 : index
    %0 = vector.load %arg1[%c0, %c0_0, %c0_1] : memref<1x32x256xf32, #tpu.memory_space<vmem>>, vector<1x32x256xf32>
    %cst = arith.constant dense<0.000000e+00> : vector<1x32xf32>
    %1 = vector.multi_reduction <add>, %0, %cst [2] : vector<1x32x256xf32> to vector<1x32xf32>
    %cst_2 = arith.constant 3.906250e-03 : f32
    %2 = vector.broadcast %cst_2 : f32 to vector<1x32xf32>
    %3 = arith.mulf %1, %2 : vector<1x32xf32>
    %cst_3 = arith.constant dense<0xFF800000> : vector<1x32xf32>
    %4 = vector.multi_reduction <maximumf>, %0, %cst_3 [2] : vector<1x32x256xf32> to vector<1x32xf32>
    %5 = tpu.concatenate %3, %4 in 0 : vector<1x32xf32>, vector<1x32xf32> -> vector<2x32xf32>
    %c0_4 = arith.constant 0 : index
    %c0_5 = arith.constant 0 : index
    %6 = vector.load %arg2[%c0_4, %c0_5] : memref<32x2xf32, #tpu.memory_space<vmem>>, vector<32x2xf32>
    %c0_6 = arith.constant 0 : index
    %c0_7 = arith.constant 0 : index
    %7 = vector.load %arg3[%c0_6, %c0_7] : memref<1x2xf32, #tpu.memory_space<vmem>>, vector<1x2xf32>
    %c0_8 = arith.constant 0 : index
    %c0_9 = arith.constant 0 : index
    %8 = vector.load %arg4[%c0_8, %c0_9] : memref<2x32xf32, #tpu.memory_space<vmem>>, vector<2x32xf32>
    %c0_10 = arith.constant 0 : index
    %c0_11 = arith.constant 0 : index
    %9 = vector.load %arg5[%c0_10, %c0_11] : memref<1x32xf32, #tpu.memory_space<vmem>>, vector<1x32xf32>
    %cst_12 = arith.constant dense<0.000000e+00> : vector<2x2xf32>
    %10 = tpu.matmul %5, %6, %cst_12 {dimension_numbers = #tpu.dot_dimension_numbers<[1], [0], [0], [1], [0, 0, 1, 1], [], []>} : vector<2x32xf32>, vector<32x2xf32>, vector<2x2xf32> -> vector<2x2xf32>
    %11 = vector.broadcast %7 : vector<1x2xf32> to vector<2x2xf32>
    %12 = arith.addf %10, %11 : vector<2x2xf32>
    %cst_13 = arith.constant 0.000000e+00 : f32
    %13 = vector.broadcast %cst_13 : f32 to vector<2x2xf32>
    %14 = arith.maximumf %12, %13 : vector<2x2xf32>
    %cst_14 = arith.constant dense<0.000000e+00> : vector<2x32xf32>
    %15 = tpu.matmul %14, %8, %cst_14 {dimension_numbers = #tpu.dot_dimension_numbers<[1], [0], [0], [1], [0, 0, 1, 1], [], []>} : vector<2x2xf32>, vector<2x32xf32>, vector<2x32xf32> -> vector<2x32xf32>
    %16 = vector.broadcast %9 : vector<1x32xf32> to vector<2x32xf32>
    %17 = arith.addf %15, %16 : vector<2x32xf32>
    %18 = vector.extract_strided_slice %17 {offsets = [0, 0], sizes = [1, 32], strides = [1, 1]} : vector<2x32xf32> to vector<1x32xf32>
    %19 = vector.extract_strided_slice %17 {offsets = [1, 0], sizes = [1, 32], strides = [1, 1]} : vector<2x32xf32> to vector<1x32xf32>
    %20 = arith.addf %18, %19 : vector<1x32xf32>
    %21 = arith.negf %20 : vector<1x32xf32>
    %22 = math.exp %21 : vector<1x32xf32>
    %cst_15 = arith.constant 1.000000e+00 : f32
    %23 = vector.broadcast %cst_15 : f32 to vector<1x32xf32>
    %24 = arith.addf %23, %22 : vector<1x32xf32>
    %25 = arith.divf %23, %24 : vector<1x32xf32>
    %26 = vector.shape_cast %25 : vector<1x32xf32> to vector<1x32x1xf32>
    %27 = vector.broadcast %26 : vector<1x32x1xf32> to vector<1x32x256xf32>
    %28 = arith.mulf %0, %27 : vector<1x32x256xf32>
    %c0_16 = arith.constant 0 : index
    %c0_17 = arith.constant 0 : index
    %c0_18 = arith.constant 0 : index
    %29 = vector.load %arg6[%c0_16, %c0_17, %c0_18] : memref<1x32x256xf32, #tpu.memory_space<vmem>>, vector<1x32x256xf32>
    tpu.vector_store %arg6[%c0_16, %c0_17, %c0_18], %28 {strides = array<i32>} : memref<1x32x256xf32, #tpu.memory_space<vmem>>, vector<1x32x256xf32>,
    %30 = vector.shape_cast %25 : vector<1x32xf32> to vector<1x32x1xf32>
    %c0_19 = arith.constant 0 : index
    %c0_20 = arith.constant 0 : index
    %c0_21 = arith.constant 0 : index
    %31 = vector.load %arg7[%c0_19, %c0_20, %c0_21] : memref<1x32x1xf32, #tpu.memory_space<vmem>>, vector<1x32x1xf32>
    tpu.vector_store %arg7[%c0_19, %c0_20, %c0_21], %30 {strides = array<i32>} : memref<1x32x1xf32, #tpu.memory_space<vmem>>, vector<1x32x1xf32>,
    return
  }
  func.func @transform_0(%arg0: i32) -> (i32, i32, i32) {
    %c0_i32 = arith.constant 0 : i32
    %c0_i32_0 = arith.constant 0 : i32
    %c0_i32_1 = arith.constant 0 : i32
    return %arg0, %c0_i32, %c0_i32_0 : i32, i32, i32
  }
  func.func @transform_1(%arg0: i32) -> (i32, i32) {
    %c0_i32 = arith.constant 0 : i32
    %c0_i32_0 = arith.constant 0 : i32
    %c0_i32_1 = arith.constant 0 : i32
    return %c0_i32, %c0_i32_0 : i32, i32
  }
  func.func @transform_2(%arg0: i32) -> (i32, i32) {
    %c0_i32 = arith.constant 0 : i32
    %c0_i32_0 = arith.constant 0 : i32
    %c0_i32_1 = arith.constant 0 : i32
    return %c0_i32, %c0_i32_0 : i32, i32
  }
  func.func @transform_3(%arg0: i32) -> (i32, i32) {
    %c0_i32 = arith.constant 0 : i32
    %c0_i32_0 = arith.constant 0 : i32
    %c0_i32_1 = arith.constant 0 : i32
    return %c0_i32, %c0_i32_0 : i32, i32
  }
  func.func @transform_4(%arg0: i32) -> (i32, i32) {
    %c0_i32 = arith.constant 0 : i32
    %c0_i32_0 = arith.constant 0 : i32
    %c0_i32_1 = arith.constant 0 : i32
    return %c0_i32, %c0_i32_0 : i32, i32
  }
  func.func @transform_5(%arg0: i32) -> (i32, i32, i32) {
    %c0_i32 = arith.constant 0 : i32
    %c0_i32_0 = arith.constant 0 : i32
    %c0_i32_1 = arith.constant 0 : i32
    return %arg0, %c0_i32, %c0_i32_0 : i32, i32, i32
  }
  func.func @transform_6(%arg0: i32) -> (i32, i32, i32) {
    %c0_i32 = arith.constant 0 : i32
    %c0_i32_0 = arith.constant 0 : i32
    %c0_i32_1 = arith.constant 0 : i32
    return %arg0, %c0_i32, %c0_i32_0 : i32, i32, i32
  }
}

</mosaic_0001>

<bundles_post_ra>
// kernel: tpu_custom_call.1
= control target key start
LH: loop header
LB: loop body
LE: loop exit
PB: predicated region body
PF: predicated region fallthrough
CT: control target
= control target key end

     0   :  { %12 = vsyncpa [#allocation3], 0  ;;  %s1217_s0 = inlined_call_operand.hbm [shape: f32[2,32,256], index: 0, kind: input, shape index: {}]   ;;  %s1218_s1 = inlined_call_operand.vmem [shape: f32[32,2], index: 1, kind: input, shape index: {}]   ;;  %s1219_s2 = inlined_call_operand.vmem [shape: f32[1,2], index: 2, kind: input, shape index: {}]   ;;  %s1220_s3 = inlined_call_operand.vmem [shape: f32[2,32], index: 3, kind: input, shape index: {}]   ;;  %s1221_s4 = inlined_call_operand.vmem [shape: f32[1,32], index: 4, kind: input, shape index: {}]   ;;  %s1222_s5 = inlined_call_operand.hbm [shape: f32[2,32,256], index: 5, kind: output, shape index: {0}]   ;;  %s1223_s6 = inlined_call_operand.vmem [shape: f32[2,32,1], index: 6, kind: output, shape index: {1}]  }
   0x1   :  { %14 = vsyncpa [#allocation3 + $0x1], 0 }
   0x2   :  { %15 = vsyncpa [#allocation4], 0 }
   0x3   :  { %17 = vsyncpa [#allocation4 + $0x1], 0  ;;  %s972_s21 = smov 0   ;;  %s974_s22 = smov 0  }
   0x4   :  { %s976_s23 = smov 0   ;;  %s978_s24 = smov 0  }
   0x5 LB: > { %s993_s25 = sadd.s32 4294967295, %s926_s24   ;;  %s719_s26 = sadd.s32 4294967294, %s926_s24   ;;  %s926_s24 = sphi %s978_s24, %s1236_s24   ;;  %s922_s23 = sphi %s976_s23, %s1235_s23   ;;  %s918_s22 = sphi %s974_s22, %s1234_s22   ;;  %s914_s21 = sphi %s972_s21, %s1233_s21  }
   0x6   : > { %s997_s27 = sadd.s32 1, %s926_s24   ;;  %s30_s28 = sadd.s32 1, %s922_s23 }
   0x7   : > { %s27_s29 = ssub.s32 %s926_s24, %s997_s27  ;;  %p37_p0 = scmp.ne.s32.totalorder %s922_s23, %s918_s22 }
   0x8   : > { %p28_p1 = scmp.eq.s32.totalorder %s27_s29, 0  ;;  %p38_p2 = scmp.eq.s32.totalorder %s926_s24, 0 }
   0x9   : > { %p43_p3 = scmp.ne.s32.totalorder %s918_s22, %s914_s21  ;;  %p44_p4 = scmp.eq.s32.totalorder %s993_s25, 0 }
   0xa   : > { %s1009_s30 = scalar_select %p28_p1, %s922_s23, %s30_s28  }
   0xb   : > { %p1011_p5 = por %p38_p2, %p37_p0  ;;  %p1015_p6 = por %p44_p4, %p43_p3 }
   0xc   : > { %p151_p7 = scmp.eq.s32.totalorder %s993_s25, 1  ;;  %p157_p8 = scmp.eq.s32.totalorder %s719_s26, 1 }
   0xd   : > { %p785_p10 = scmp.lt.s32.totalorder %s926_s24, 2  ;;  %s215_s11 = sand.u32 1, %s922_s23  }
   0xe   : > { %p1022_p11 = por %p151_p7, %p37_p0  ;;  %p1026_p12 = por %p157_p8, %p43_p3 }
   0xf   : > { %s741_s12 = sshll.u32 %s926_s24, 10  ;;  %s722_s13 = sshll.u32 %s215_s11, 6 }
  0x10   : > { %s1227_s9 = scalar_select %p1022_p11, 1, 0 }
  0x11   : > { %s1228_s10 = scalar_select %p1026_p12, 1, 0 }
  0x12   : > { %s1035_s16 = scalar_lea.hbm %s1217_s0, %s741_s12  ;;  %s219_s17 = scalar_lea.vmem [#allocation2], %s722_s13 }
  0x13   : > { %s226_s18 = sshll.u32 %s219_s17, 4  ;;  %p1039_p13 = pnand %p785_p10, %p1011_p5  ;;  %s1043_s18 = int_to_ptr.vmem [resolvable:$true] %s226_s18 }
  0x14   : > { %s1045_s20 = scalar_lea.sflag [#allocation3], %s215_s11  ;;  %s830_s26 = scalar_lea.hbm %s1035_s16, 1024 }
  0x15   : > { %p831_p0 = scmp.ne.s32.totalorder %s1035_s16, %s830_s26  ;;  %p832_p1 = pneg %p1039_p13 }
  0x16   : > { %s835_s7 = scalar_lea.hbm %s1217_s0, 2048  ;;  %p836_p4 = scmp.lt.u32.totalorder %s1035_s16, %s1217_s0 }
  0x17   : > { %p833_p2 = pnand %p832_p1, %p831_p0  ;;  %p837_p5 = scmp.lt.u32.totalorder %s835_s7, %s830_s26 }
  0x18   : > { %p839_p8 = scmp.lt.u32.totalorder %s830_s26, %s1035_s16 }
  0x19   : > { %p834_p3 = pneg %p833_p2  ;;  %p838_p7 = por %p837_p5, %p836_p4 }
  0x1b   : > { %p840_p10 = por %p839_p8, %p838_p7 }
  0x1d   : > { %p841_p9 = pnand %p840_p10, %p834_p3 }
  0x1f   : > { %844 = shalt.err (!%p841_p9)
}
  0x20   : > { %s845_s11 = scalar_lea.vmem %s1043_s18, 1024  ;;  %s928_s14 = smov [#allocation2]  }
  0x21   : > { %p846_p0 = scmp.ne.s32.totalorder %s1043_s18, %s845_s11  ;;  %s850_s15 = sshll.u32 %s928_s14, 4  ;;  %s851_s15 = int_to_ptr.vmem [resolvable:$false] %s850_s15 }
  0x22   : > { %s852_s17 = scalar_lea.vmem %s851_s15, 2048  ;;  %p853_p11 = scmp.lt.s32.totalorder %s1043_s18, %s851_s15 }
  0x23   : > { %p848_p2 = pnand %p846_p0, %p832_p1  ;;  %p854_p4 = scmp.lt.s32.totalorder %s852_s17, %s845_s11 }
  0x25   : > { %p849_p12 = pneg %p848_p2  ;;  %p855_p5 = por %p854_p4, %p853_p11 }
  0x27   : > { %p856_p7 = pnand %p855_p5, %p849_p12 }
  0x29   : > { %859 = shalt.err (!%p856_p7)
}
  0x2a   : > { %s929_s26 = smov 256   ;;  %s930_s28 = smov 16  }
  0x2b   : > { %780 = dma.hbm_to_vmem [thread:$0]  (!%p1039_p13), %s1035_s16, 1024, %s1043_s18, %s1045_s20, %s929_s26, %s929_s26, %s930_s28  }
  0x2c   : > { %p725_p9 = scmp.ge.s32.totalorder %s926_s24, 1  ;;  %p234_p1 = scmp.lt.s32.totalorder %s926_s24, 3 }
  0x2e   : > { %p235_p3 = pnand %p725_p9, %p234_p1 }
  0x2f   : > { %s1076_s29 = sand.u32 (!%p235_p3), 1, %s918_s22  }
  0x30   : > { %238 = sbr.rel (%p235_p3) target bundleno = 821 (0x335), region = 40  ;;  %s726_s7 = sshll.u32 (!%p235_p3), %s1076_s29, 6 }
  0x31   : > { %s241_s12 = scalar_lea.sflag (!%p235_p3), [#allocation3], %s1076_s29  ;;  %s244_s13 = scalar_lea.vmem (!%p235_p3), [#allocation2], %s726_s7 }
  0x37   : > { %905 = dma.done.wait (%p1015_p6), %s241_s12, 1024  }
  0x38   : > { %907 = vsyncadd (%p1015_p6), %s241_s12, 4294966272  ;;  %v1086_v0 = vld [vmem:[%s244_s13 + $0x20] sm:$0xff]  ;;  %v1088_v1 = vld [vmem:[%s244_s13 + $0x28] sm:$0xff]  ;;  %v931_v19 = vmov 0.0|0.0   ;;  %vm932_vm0 = vmmov 0   ;;  %v933_v23 = vmov 0.0   ;;  %v323_v24 = vlaneseq }
  0x39   : > { %v1090_v2 = vld [vmem:[%s244_s13] sm:$0xff]  ;;  %v297_v3 = vadd.f32 %v1088_v1, %v1086_v0  ;;  %v1094_v4 = vld [vmem:[%s244_s13 + $0x8] sm:$0xff]  ;;  %v1096_v5 = vld [vmem:[%s244_s13 + $0x30] sm:$0xff]  ;;  %v313_v15 = vmax.f32 %v1086_v0, %v1088_v1  ;;  %767 = vmatprep.subr.bf16.mxu0 %v931_v19  ;;  %759 = vmatprep.mubr.msk.f32.mxu0 %vm932_vm0, %v933_v23  ;;  %vm334_vm1 = vcmask 130112   ;;  %vm341_vm2 = vcmask 195712   ;;  %p278_p6 = scmp.lt.s32.totalorder %s993_s25, 1 }
  0x3a   : > { %v1098_v6 = vld [vmem:[%s244_s13 + $0x38] sm:$0xff]  ;;  %v291_v7 = vadd.f32 %v1094_v4, %v1090_v2  ;;  %v1102_v8 = vld [vmem:[%s244_s13 + $0x10] sm:$0xff]  ;;  %v307_v13 = vmax.f32 %v1090_v2, %v1094_v4  ;;  %v377_v16 = vld [vmem:[%s1218_s1] sm:$0xff]  ;;  %762 = vmatprep.subr.mxu1 %v933_v23  ;;  %764 = vmatprep.mubr.msk.f32.mxu1 %vm932_vm0, %v933_v23  ;;  %v324_v25 = vand.u32 127, %v323_v24  ;;  %v1130_v28 = vshrl.u32 %v323_v24, 7  ;;  %s270_s14 = scalar_lea.vmem [#allocation5], %s726_s7 }
  0x3b   : > { %v1104_v9 = vld [vmem:[%s244_s13 + $0x18] sm:$0xff]  ;;  %298 = vadd.xlane.f32.xlu1 %v297_v3  ;;  %v300_v10 = vadd.f32 %v1098_v6, %v1096_v5  ;;  %v316_v14 = vmax.f32 %v1096_v5, %v1098_v6  ;;  %v378_v17 = vld [vmem:[%s1218_s1 + $0x8] sm:$0xff]  ;;  %v379_v20 = vld [vmem:[%s1218_s1 + $0x10] sm:$0xff]  ;;  %vm348_vm3 = vcmask 261312   ;;  %vm375_vm4 = vcmask 1040384   ;;  %s279_s16 = scalar_select %p278_p6, %s993_s25, 1 }
  0x3c   : > { %292 = vadd.xlane.f32.xlu0 %v291_v7  ;;  %v294_v11 = vadd.f32 %v1104_v9, %v1102_v8  ;;  %v310_v12 = vmax.f32 %v1102_v8, %v1104_v9  ;;  %v768_v18 = vpack.c.bf16 %v378_v17, %v377_v16  ;;  %v380_v21 = vld [vmem:[%s1218_s1 + $0x18] sm:$0xff]  ;;  %v329_v27 = vadd.s32 4294967288, %v324_v25  ;;  %v382_v61 = vld [vmem:[%s1220_s3] sm:$0x3]  ;;  %s618_s15 = sshll.u32 %s270_s14, 4  ;;  %s743_s17 = sshll.u32 %s993_s25, 10  ;;  %s1170_s15 = int_to_ptr.vmem [resolvable:$true] %s618_s15 }
  0x3d   : > { %v771_v22 = vpack.c.bf16 %v380_v21, %v379_v20  ;;  %v336_v30 = vadd.s32 4294967280, %v324_v25  ;;  %v327_v33 = vsub.s32 %v324_v25, %v1130_v28  ;;  %v343_v35 = vadd.s32 4294967272, %v324_v25  ;;  %v730_v62 = vld [vmem:[%s1219_s2] ss:$0 sm:$0xff]  ;;  %s742_s18 = sshll.u32 %s279_s16, 5  ;;  %s1168_s28 = scalar_lea.hbm %s1222_s5, %s743_s17 }
  0x3e   : > { %769 = vmatpush3.bf16.msra.mxu0 %v768_v18  ;;  %v332_v32 = vsub.s32 %v329_v27, %v1130_v28  ;;  %vm390_vm5 = vcmask 261120   ;;  %vm475_vm6 = vcmask 1041408   ;;  %vm471_vm7 = vcmask 15360   ;;  %s282_s11 = scalar_lea.vmem %s1223_s6, %s742_s18  ;;  %s600_s25 = scalar_lea.sflag [#allocation4], %s1076_s29 }
  0x3f   : > { %301 = vadd.xlane.f32.xlu1 %v300_v10  ;;  %770 = vmatprep.subr.bf16.mxu0 %v931_v19  ;;  %v339_v38 = vsub.s32 %v336_v30, %v1130_v28  ;;  %v346_v43 = vsub.s32 %v343_v35, %v1130_v28  ;;  %v561_v20 = vsub.s32 0, %v1130_v28  ;;  %vm594_vm8 = vcmask 7168   ;;  %s860_s12 = scalar_lea.vmem %s1170_s15, 1024  ;;  %p1230_p12 = scmp.ne.s32.totalorder %s1227_s9, 0 }
  0x40   : > { %295 = vadd.xlane.f32.xlu0 %v294_v11  ;;  %763 = vmatpush3.msk.msra.mxu1 %vm475_vm6, %v382_v61  ;;  %v732_v11 = vld [vmem:[%s1221_s4] ss:$0 sm:$0xff]  ;;  %p861_p11 = scmp.ne.s32.totalorder %s1170_s15, %s860_s12  ;;  %s934_s13 = smov [#allocation5]  }
  0x41   : > { %s864_s8 = sshll.u32 %s934_s13, 4  ;;  %s865_s8 = int_to_ptr.vmem [resolvable:$false] %s864_s8 }
  0x42   : > { %772 = vmatpush3.bf16.msra.mxu0 %v771_v22  ;;  %p862_p13 = pnand %p861_p11, %p1230_p12  ;;  %s866_s16 = scalar_lea.vmem %s865_s8, 2048 }
  0x43   : > { %311 = vmax.xlane.f32.xlu1 %v310_v12  ;;  %p867_p10 = scmp.lt.s32.totalorder %s1170_s15, %s865_s8  ;;  %p868_p0 = scmp.lt.s32.totalorder %s866_s16, %s860_s12 }
  0x44   : > { %308 = vmax.xlane.f32.xlu0 %v307_v13  ;;  %p863_p8 = pneg %p862_p13 }
  0x45   : > { %p869_p2 = por %p868_p0, %p867_p10 }
  0x47   : > { %317 = vmax.xlane.f32.xlu1 %v316_v14  ;;  %p870_p4 = pnand %p869_p2, %p863_p8 }
  0x48   : > { %314 = vmax.xlane.f32.xlu0 %v313_v15 }
  0xc8   : > { %v299_v26 = vpop.xlane.xlu1 %298 }
  0xc9   : > { %v293_v29 = vpop.xlane.xlu0 %292  ;;  %v305_v39 = vmul.f32 0.00390625, %v299_v26 }
  0xca   : > { %v303_v34 = vmul.f32 0.00390625, %v293_v29 }
  0xcb   : > { %v340_v49 = vrot.slane %v305_v39, %v339_v38 }
  0xcc   : > { %v302_v31 = vpop.xlane.xlu1 %301  ;;  %v328_v42 = vrot.slane %v303_v34, %v327_v33 }
  0xcd   : > { %v296_v36 = vpop.xlane.xlu0 %295  ;;  %v306_v44 = vmul.f32 0.00390625, %v302_v31 }
  0xce   : > { %v304_v37 = vmul.f32 0.00390625, %v296_v36 }
  0xcf   : > { %v347_v51 = vrot.slane %v306_v44, %v346_v43 }
  0xd0   : > { %v333_v40 = vrot.slane %v304_v37, %v332_v32  ;;  %v312_v41 = vpop.xlane.xlu1 %311 }
  0xd1   : > { %v309_v45 = vpop.xlane.xlu0 %308  ;;  %v362_v47 = vrot.slane %v312_v41, %v332_v32 }
  0xd2   : > { %v335_v46 = vsel %vm334_vm1, %v333_v40, %v328_v42  ;;  %v358_v48 = vrot.slane %v309_v45, %v327_v33 }
  0xd3   : > { %v342_v55 = vsel %vm341_vm2, %v340_v49, %v335_v46 }
  0xd4   : > { %v318_v50 = vpop.xlane.xlu1 %317  ;;  %v363_v56 = vsel %vm334_vm1, %v362_v47, %v358_v48  ;;  %v349_v59 = vsel %vm348_vm3, %v347_v51, %v342_v55 }
  0xd5   : > { %v315_v52 = vpop.xlane.xlu0 %314  ;;  %v372_v53 = vrot.slane %v318_v50, %v346_v43 }
  0xd6   : > { %v367_v54 = vrot.slane %v315_v52, %v339_v38 }
  0xd8   : > { %v368_v57 = vsel %vm341_vm2, %v367_v54, %v363_v56 }
  0xd9   : > { %v373_v58 = vsel %vm348_vm3, %v372_v53, %v368_v57 }
  0xda   : > { %v376_v60 = vsel %vm375_vm4, %v349_v59, %v373_v58 }
  0xdb   : > { %760 = vmatmul.mubr.msk.f32.vlgmr.msra.gmra.mrb[0].mxu0 %vm390_vm5, %v376_v60 }
 0x1ae   : > { %v460_v63 = vpop.f32.mrb[0].mxu0 }
 0x1af   : > { %v461_v3 = vadd.f32 %v730_v62, %v460_v63  ;;  %v761_v7 = vpop.f32.mrb[1].mxu0 }
 0x1b1   : > { %v464_v10 = vmax.f32 %v461_v3, 0.0 }
 0x1b3   : > { %765 = vmatmul.mubr.msk.f32.vlgmr.msra.gmra.mrb[0].mxu1 %vm471_vm7, %v464_v10 }
 0x286   : > { %v545_v12 = vpop.f32.mrb[0].mxu1 }
 0x287   : > { %v546_v13 = vadd.f32 %v732_v11, %v545_v12  ;;  %v766_v14 = vpop.f32.mrb[1].mxu1 }
 0x289   : > { %v550_v15 = vrot.slane %v546_v13, 1 }
 0x28b   : > { %v552_v16 = vadd.f32 %v550_v15, %v546_v13 }
 0x28d   : > { %v735_v17 = vmul.f32 -1.442695, %v552_v16 }
 0x28f   : > { %826 = vpow2.f32 %v735_v17 }
 0x299   : > { %v827_v18 = vpop.eup %826 }
 0x29a   : > { %v556_v19 = vadd.f32 1.0, %v827_v18 }
 0x29c   : > { %828 = vrcp.f32 %v556_v19 }
 0x2a6   : > { %v829_v21 = vpop.eup %828 }
 0x2a7   : > { %v562_v22 = vrot.slane %v829_v21, %v561_v20 }
 0x2a9   : > { %568 = vbcast.lane.b32.xlu1 %v562_v22, 264  ;;  %564 = vbcast.lane.b32.xlu0 %v562_v22, 256 }
 0x2ad   : > { %572 = vbcast.lane.b32.xlu1 %v562_v22, 272 }
 0x2b1   : > { %576 = vbcast.lane.b32.xlu1 %v562_v22, 280 }
 0x31b   : > { %v569_v23 = vpop.permute.xlu1 %568  ;;  %v565_v24 = vpop.permute.xlu0 %564 }
 0x31c   : > { %v580_v25 = vmul.f32 %v569_v23, %v1102_v8  ;;  %v581_v26 = vmul.f32 %v569_v23, %v1104_v9  ;;  %596 = vst.msk [vmem:[%s282_s11 + $0x8] sm:$0xff] %vm594_vm8, %v569_v23  ;;  %v578_v27 = vmul.f32 %v565_v24, %v1090_v2  ;;  %v579_v28 = vmul.f32 %v565_v24, %v1094_v4 }
 0x31d   : > { %595 = vst.msk [vmem:[%s282_s11] sm:$0xff] %vm594_vm8, %v565_v24 }
 0x31e   : > { %588 = vst [vmem:[%s270_s14 + $0x10] sm:$0xff] %v580_v25  ;;  %589 = vst [vmem:[%s270_s14 + $0x18] sm:$0xff] %v581_v26 }
 0x31f   : > { %586 = vst [vmem:[%s270_s14] sm:$0xff] %v578_v27  ;;  %587 = vst [vmem:[%s270_s14 + $0x8] sm:$0xff] %v579_v28  ;;  %v573_v29 = vpop.permute.xlu1 %572 }
 0x320   : > { %v582_v8 = vmul.f32 %v573_v29, %v1086_v0  ;;  %v583_v9 = vmul.f32 %v573_v29, %v1088_v1  ;;  %597 = vst.msk [vmem:[%s282_s11 + $0x10] sm:$0xff] %vm594_vm8, %v573_v29 }
 0x322   : > { %590 = vst [vmem:[%s270_s14 + $0x20] sm:$0xff] %v582_v8  ;;  %591 = vst [vmem:[%s270_s14 + $0x28] sm:$0xff] %v583_v9 }
 0x323   : > { %v577_v2 = vpop.permute.xlu1 %576 }
 0x324   : > { %v584_v0 = vmul.f32 %v577_v2, %v1096_v5  ;;  %v585_v1 = vmul.f32 %v577_v2, %v1098_v6  ;;  %598 = vst.msk [vmem:[%s282_s11 + $0x18] sm:$0xff] %vm594_vm8, %v577_v2 }
 0x326   : > { %592 = vst [vmem:[%s270_s14 + $0x30] sm:$0xff] %v584_v0  ;;  %593 = vst [vmem:[%s270_s14 + $0x38] sm:$0xff] %v585_v1 }
 0x327   : > { %873 = shalt.err (!%p870_p4)
}
 0x328   : > { %s874_s18 = scalar_lea.hbm %s1168_s28, 1024  ;;  %s878_s11 = scalar_lea.hbm %s1222_s5, 2048 }
 0x329   : > { %p875_p5 = scmp.ne.s32.totalorder %s1168_s28, %s874_s18  ;;  %p879_p1 = scmp.lt.u32.totalorder %s1168_s28, %s1222_s5 }
 0x32a   : > { %p880_p3 = scmp.lt.u32.totalorder %s878_s11, %s874_s18  ;;  %p882_p11 = scmp.lt.u32.totalorder %s874_s18, %s1168_s28 }
 0x32b   : > { %p876_p7 = pnand %p875_p5, %p1230_p12 }
 0x32c   : > { %p881_p6 = por %p880_p3, %p879_p1 }
 0x32d   : > { %p877_p9 = pneg %p876_p7 }
 0x32e   : > { %p883_p13 = por %p882_p11, %p881_p6 }
 0x330   : > { %p884_p8 = pnand %p883_p13, %p877_p9 }
 0x332   : > { %887 = shalt.err (!%p884_p8)
}
 0x333   : > { %s935_s26 = smov 256   ;;  %s936_s7 = smov 16  }
 0x334   : > { %775 = dma.vmem_to_hbm [thread:$0]  (%p1230_p12), %s1170_s15, 1024, %s1168_s28, %s600_s25, %s935_s26, %s935_s26, %s936_s7  }
 0x335 PF: > { %s636_s12 = sand.u32 1, %s914_s21   ;;  %p1231_p10 = scmp.ne.s32.totalorder %s1228_s10, 0 }
 0x336   : > { %p1232_p0 = scmp.ge.s32.totalorder %s926_s24, 2  ;;  %s637_s13 = scalar_lea.sflag [#allocation4], %s636_s12 }
 0x338   : > { %p782_p2 = pnand %p1232_p0, %p1231_p10 }
 0x33a   : > { %909 = dma.done.wait (!%p782_p2), %s637_s13, 1024  }
 0x33b   : > { %911 = vsyncadd (!%p782_p2), %s637_s13, 4294966272  ;;  %p20_p4 = scmp.ge.s32.totalorder %s997_s27, 4   ;;  %s1233_s21 = smov %s918_s22 }
 0x33c   : > { %s1234_s22 = smov %s922_s23  ;;  %s1235_s23 = smov %s1009_s30 }
 0x33d   : > { %s1236_s24 = smov %s997_s27  ;;  %22 = sbr.rel (!%p20_p4) target bundleno = 5 (0x5), region = 97 }
 0x344   :  { %650 = vsyncpa [#allocation3], 1 }
 0x345   :  { %652 = vsyncpa [#allocation3 + $0x1], 1 }
 0x346   :  { %653 = vsyncpa [#allocation4], 1 }
 0x347   :  { %655 = vsyncpa [#allocation4 + $0x1], 1 }

</bundles_post_ra>
